<compile_context>
chip_gen: v7x
topology: tpu7x:2x2x1
jax: 0.10.0
libtpu: 0.0.40
codegen_flags: <defaults>
</compile_context>

<pallas_src>
import jax
import jax.numpy as jnp
from jax.experimental import pallas as pl
from jax.experimental.pallas import tpu as pltpu


def _mean_pool_kernel(x_ref, m_ref, o_ref, acc_ref, cnt_ref):
    # x_ref:   (Bt, St, H)  input dtype
    # m_ref:   (Bt, St, 1)  float32 mask (S on the sublane axis, like x)
    # o_ref:   (Bt, H)      output tile (sublane/lane dense)
    # acc_ref: (Bt, H)      float32 running masked sum
    # cnt_ref: (Bt, 1)      float32 running mask count
    s = pl.program_id(1)

    @pl.when(s == 0)
    def _init():
        acc_ref[...] = jnp.zeros_like(acc_ref)
        cnt_ref[...] = jnp.zeros_like(cnt_ref)

    x = x_ref[...].astype(jnp.float32)          # (Bt, St, H) f32 in-register
    m = m_ref[...]                              # (Bt, St, 1), already float32
    acc_ref[...] += jnp.sum(x * m, axis=1)      # lane-broadcast m, reduce over St
    cnt_ref[...] += jnp.sum(m, axis=1)          # (Bt, 1)

    @pl.when(s == pl.num_programs(1) - 1)
    def _finalize():
        # Reciprocal of the tiny (Bt, 1) count, then one broadcast multiply of
        # the (Bt, H) accumulator (instead of dividing the full accumulator).
        inv = 1.0 / cnt_ref[...]                # all-zero mask rows -> inf/NaN (matches PyTorch)
        o_ref[...] = (acc_ref[...] * inv).astype(o_ref.dtype)


def _round_up(n: int, m: int) -> int:
    return (n + m - 1) // m * m


def led_mean_pooler(
    x: jax.Array,
    masks: jax.Array,
    *,
    max_block_s: int = 4096,
    target_x_block_bytes: int = 4 * 1024 * 1024,
) -> jax.Array:
    """Masked mean pooling over dim 1: (x * masks[..., None]).sum(1) / masks.sum(-1, keepdims)."""
    B, S, H = x.shape
    assert masks.shape == (B, S), (masks.shape, (B, S))
    itemsize = jnp.dtype(x.dtype).itemsize

    # ---- batch tile: avoid padding (full-HBM copy of x) whenever possible ----
    if B % 8 == 0:
        Bt, B_pad = 8, B                         # sublane-full output tiles, megacore over B/8
    elif B <= 64:
        Bt, B_pad = B, B                         # block == full dim: legal, no padding
    else:
        Bt, B_pad = 8, _round_up(B, 8)           # rare: large ragged batch -> pad

    # ---- sequence tile: keep one (Bt, St, H) x buffer near target bytes so the
    # double-buffered pipeline fits the default scoped-VMEM limit everywhere.
    st_target = target_x_block_bytes // max(1, Bt * H * itemsize)
    st_target = max(8, min(int(st_target), max_block_s))
    st_target = (st_target // 8) * 8

    if S <= st_target:
        St, S_pad = S, S                         # single seq tile, block == full dim
    else:
        St = 0
        lo = max(8, min(256, st_target))
        # Prefer a tile (multiple of 8) that divides S exactly: avoids padding x.
        for cand in range(st_target, lo - 1, -8):
            if S % cand == 0:
                St, S_pad = cand, S
                break
        if St == 0:
            St = st_target
            S_pad = _round_up(S, St)

    m = masks.astype(jnp.float32)
    pad_b, pad_s = B_pad - B, S_pad - S
    if pad_b or pad_s:
        # Zero-padded mask rows/positions contribute nothing to sum or count.
        x = jnp.pad(x, ((0, pad_b), (0, pad_s), (0, 0)))
        m = jnp.pad(m, ((0, pad_b), (0, pad_s)))
    m = m[:, :, None]                            # (B_pad, S_pad, 1): S on sublanes in-kernel

    grid = (B_pad // Bt, S_pad // St)

    out = pl.pallas_call(
        _mean_pool_kernel,
        out_shape=jax.ShapeDtypeStruct((B_pad, H), x.dtype),
        grid_spec=pltpu.PrefetchScalarGridSpec(
            num_scalar_prefetch=0,
            grid=grid,
            in_specs=[
                pl.BlockSpec((Bt, St, H), lambda b, s: (b, s, 0)),
                pl.BlockSpec((Bt, St, 1), lambda b, s: (b, s, 0)),
            ],
            # Same output block across the sequence axis -> resident until the
            # final S tile writes it.
            out_specs=pl.BlockSpec((Bt, H), lambda b, s: (b, 0)),
            scratch_shapes=[
                pltpu.VMEM((Bt, H), jnp.float32),   # masked-sum accumulator
                pltpu.VMEM((Bt, 1), jnp.float32),   # mask-count accumulator
            ],
        ),
        compiler_params=pltpu.CompilerParams(
            # Batch tiles are independent (megacore-parallel); the sequence
            # axis carries the accumulator, so it must be arbitrary.
            dimension_semantics=("parallel", "arbitrary"),
        ),
    )(x, m)

    return out if B_pad == B else out[:B]


def _reference(x, masks):
    num_el = jnp.sum(masks, axis=-1, keepdims=True)
    return jnp.sum(x * masks[:, :, None], axis=1) / num_el


if __name__ == "__main__":
    # Case 1: small shapes consistent with the module: batch=2, seq=8, hidden=32.
    kx, km = jax.random.split(jax.random.PRNGKey(0))
    B, S, H = 2, 8, 32
    x = jax.random.normal(kx, (B, S, H), dtype=jnp.float32)
    masks = (jax.random.uniform(km, (B, S)) > 0.3).astype(jnp.float32)
    masks = masks.at[:, 0].set(1.0)              # at least one valid token per row

    out = jax.block_until_ready(led_mean_pooler(x, masks))
    ref = _reference(x, masks)
    assert out.shape == (B, H)
    assert jnp.allclose(out, ref, atol=1e-5, rtol=1e-5), float(jnp.max(jnp.abs(out - ref)))

    # Case 2: multi-tile sequence where St divides S exactly -> no padding copy.
    kx2, km2 = jax.random.split(jax.random.PRNGKey(1))
    B2, S2, H2 = 3, 48, 32
    x2 = jax.random.normal(kx2, (B2, S2, H2), dtype=jnp.float32)
    m2 = (jax.random.uniform(km2, (B2, S2)) > 0.5).astype(jnp.float32)
    m2 = m2.at[:, 0].set(1.0)
    out2 = jax.block_until_ready(
        led_mean_pooler(x2, m2, target_x_block_bytes=B2 * 16 * H2 * 4)
    )
    ref2 = _reference(x2, m2)
    assert out2.shape == (B2, H2)
    assert jnp.allclose(out2, ref2, atol=1e-5, rtol=1e-5), float(jnp.max(jnp.abs(out2 - ref2)))

    # Case 3: ragged sequence (S not a multiple of 8) -> exercises the padding
    # fallback; padded positions carry mask 0 and contribute nothing.
    kx3, km3 = jax.random.split(jax.random.PRNGKey(2))
    B3, S3, H3 = 10, 20, 32
    x3 = jax.random.normal(kx3, (B3, S3, H3), dtype=jnp.bfloat16)
    m3 = (jax.random.uniform(km3, (B3, S3)) > 0.4).astype(jnp.float32)
    m3 = m3.at[:, 0].set(1.0)
    out3 = jax.block_until_ready(
        led_mean_pooler(x3, m3, target_x_block_bytes=B3 * 8 * H3 * 2)
    )
    ref3 = _reference(x3.astype(jnp.float32), m3)
    assert out3.shape == (B3, H3)
    assert jnp.allclose(out3.astype(jnp.float32), ref3, atol=2e-2, rtol=2e-2), float(
        jnp.max(jnp.abs(out3.astype(jnp.float32) - ref3))
    )

    print("KERNEL_OK")
</pallas_src>

<mosaic_0001>
module attributes {stable_mosaic.version = 11 : i64} {
  func.func @_mean_pool_kernel(%arg0: i32, %arg1: i32, %arg2: memref<2x8x32xf32, #tpu.memory_space<vmem>>, %arg3: memref<2x8x1xf32, #tpu.memory_space<vmem>>, %arg4: memref<2x32xf32, #tpu.memory_space<vmem>>, %arg5: memref<2x32xf32, #tpu.memory_space<vmem>>, %arg6: memref<2x1xf32, #tpu.memory_space<vmem>>) attributes {dimension_semantics = [#tpu.dimension_semantics<parallel>, #tpu.dimension_semantics<arbitrary>], iteration_bounds = array<i64: 1, 1>, scalar_prefetch = 0 : i64, scratch_operands = 2 : i64, tpu.core_type = #tpu.core_type<tc>, window_params = [{transform_indices = @transform_0, window_bounds = array<i64: 2, 8, 32>}, {transform_indices = @transform_1, window_bounds = array<i64: 2, 8, 1>}, {transform_indices = @transform_2, window_bounds = array<i64: 2, 32>}]} {
    %c0_i32 = arith.constant 0 : i32
    %0 = arith.cmpi eq, %arg1, %c0_i32 : i32
    %1 = arith.extui %0 : i1 to i32
    %c0_i32_0 = arith.constant 0 : i32
    %2 = arith.cmpi ne, %1, %c0_i32_0 : i32
    scf.if %2 {
      %cst_17 = arith.constant 0.000000e+00 : f32
      %18 = vector.broadcast %cst_17 : f32 to vector<2x32xf32>
      %c0_18 = arith.constant 0 : index
      %c0_19 = arith.constant 0 : index
      %19 = vector.load %arg5[%c0_18, %c0_19] : memref<2x32xf32, #tpu.memory_space<vmem>>, vector<2x32xf32>
      tpu.vector_store %arg5[%c0_18, %c0_19], %18 {strides = array<i32>} : memref<2x32xf32, #tpu.memory_space<vmem>>, vector<2x32xf32>,
      %cst_20 = arith.constant 0.000000e+00 : f32
      %20 = vector.broadcast %cst_20 : f32 to vector<2x1xf32>
      %c0_21 = arith.constant 0 : index
      %c0_22 = arith.constant 0 : index
      %21 = vector.load %arg6[%c0_21, %c0_22] : memref<2x1xf32, #tpu.memory_space<vmem>>, vector<2x1xf32>
      tpu.vector_store %arg6[%c0_21, %c0_22], %20 {strides = array<i32>} : memref<2x1xf32, #tpu.memory_space<vmem>>, vector<2x1xf32>,
    } else {
    }
    %c0 = arith.constant 0 : index
    %c0_1 = arith.constant 0 : index
    %c0_2 = arith.constant 0 : index
    %3 = vector.load %arg2[%c0, %c0_1, %c0_2] : memref<2x8x32xf32, #tpu.memory_space<vmem>>, vector<2x8x32xf32>
    %c0_3 = arith.constant 0 : index
    %c0_4 = arith.constant 0 : index
    %c0_5 = arith.constant 0 : index
    %4 = vector.load %arg3[%c0_3, %c0_4, %c0_5] : memref<2x8x1xf32, #tpu.memory_space<vmem>>, vector<2x8x1xf32>
    %c0_6 = arith.constant 0 : index
    %c0_7 = arith.constant 0 : index
    %5 = vector.load %arg5[%c0_6, %c0_7] : memref<2x32xf32, #tpu.memory_space<vmem>>, vector<2x32xf32>
    %6 = vector.broadcast %4 : vector<2x8x1xf32> to vector<2x8x32xf32>
    %7 = arith.mulf %3, %6 : vector<2x8x32xf32>
    %cst = arith.constant dense<0.000000e+00> : vector<2x32xf32>
    %8 = vector.multi_reduction <add>, %7, %cst [1] : vector<2x8x32xf32> to vector<2x32xf32>
    %9 = arith.addf %5, %8 : vector<2x32xf32>
    %c0_8 = arith.constant 0 : index
    %c0_9 = arith.constant 0 : index
    %10 = vector.load %arg5[%c0_8, %c0_9] : memref<2x32xf32, #tpu.memory_space<vmem>>, vector<2x32xf32>
    tpu.vector_store %arg5[%c0_8, %c0_9], %9 {strides = array<i32>} : memref<2x32xf32, #tpu.memory_space<vmem>>, vector<2x32xf32>,
    %c0_10 = arith.constant 0 : index
    %c0_11 = arith.constant 0 : index
    %11 = vector.load %arg6[%c0_10, %c0_11] : memref<2x1xf32, #tpu.memory_space<vmem>>, vector<2x1xf32>
    %cst_12 = arith.constant dense<0.000000e+00> : vector<2x1xf32>
    %12 = vector.multi_reduction <add>, %4, %cst_12 [1] : vector<2x8x1xf32> to vector<2x1xf32>
    %13 = arith.addf %11, %12 : vector<2x1xf32>
    %c0_13 = arith.constant 0 : index
    %c0_14 = arith.constant 0 : index
    %14 = vector.load %arg6[%c0_13, %c0_14] : memref<2x1xf32, #tpu.memory_space<vmem>>, vector<2x1xf32>
    tpu.vector_store %arg6[%c0_13, %c0_14], %13 {strides = array<i32>} : memref<2x1xf32, #tpu.memory_space<vmem>>, vector<2x1xf32>,
    %c0_i32_15 = arith.constant 0 : i32
    %15 = arith.cmpi eq, %arg1, %c0_i32_15 : i32
    %16 = arith.extui %15 : i1 to i32
    %c0_i32_16 = arith.constant 0 : i32
    %17 = arith.cmpi ne, %16, %c0_i32_16 : i32
    scf.if %17 {
      %c0_17 = arith.constant 0 : index
      %c0_18 = arith.constant 0 : index
      %18 = vector.load %arg6[%c0_17, %c0_18] : memref<2x1xf32, #tpu.memory_space<vmem>>, vector<2x1xf32>
      %cst_19 = arith.constant 1.000000e+00 : f32
      %19 = vector.broadcast %cst_19 : f32 to vector<2x1xf32>
      %20 = arith.divf %19, %18 : vector<2x1xf32>
      %c0_20 = arith.constant 0 : index
      %c0_21 = arith.constant 0 : index
      %21 = vector.load %arg5[%c0_20, %c0_21] : memref<2x32xf32, #tpu.memory_space<vmem>>, vector<2x32xf32>
      %22 = vector.broadcast %20 : vector<2x1xf32> to vector<2x32xf32>
      %23 = arith.mulf %21, %22 : vector<2x32xf32>
      %c0_22 = arith.constant 0 : index
      %c0_23 = arith.constant 0 : index
      %24 = vector.load %arg4[%c0_22, %c0_23] : memref<2x32xf32, #tpu.memory_space<vmem>>, vector<2x32xf32>
      tpu.vector_store %arg4[%c0_22, %c0_23], %23 {strides = array<i32>} : memref<2x32xf32, #tpu.memory_space<vmem>>, vector<2x32xf32>,
    } else {
    }
    return
  }
  func.func @transform_0(%arg0: i32, %arg1: i32) -> (i32, i32, i32) {
    %c0_i32 = arith.constant 0 : i32
    %c0_i32_0 = arith.constant 0 : i32
    return %arg0, %arg1, %c0_i32 : i32, i32, i32
  }
  func.func @transform_1(%arg0: i32, %arg1: i32) -> (i32, i32, i32) {
    %c0_i32 = arith.constant 0 : i32
    %c0_i32_0 = arith.constant 0 : i32
    return %arg0, %arg1, %c0_i32 : i32, i32, i32
  }
  func.func @transform_2(%arg0: i32, %arg1: i32) -> (i32, i32) {
    %c0_i32 = arith.constant 0 : i32
    %c0_i32_0 = arith.constant 0 : i32
    return %arg0, %c0_i32 : i32, i32
  }
}

</mosaic_0001>

<bundles_post_ra>
// kernel: tpu_custom_call.1
= control target key start
LH: loop header
LB: loop body
LE: loop exit
PB: predicated region body
PF: predicated region fallthrough
CT: control target
= control target key end

     0   :  { %vm61_vm0 = vcmask 7168   ;;  %v142_v2 = vmov 0   ;;  %vm18_vm1 = vcmask 1024   ;;  %v143_v7 = vmov 0.0   ;;  %s191_s0 = inlined_call_operand.vmem [shape: f32[2,8,32], index: 0, kind: input, shape index: {}]   ;;  %s192_s1 = inlined_call_operand.vmem [shape: f32[2,8,1], index: 1, kind: input, shape index: {}]   ;;  %s193_s2 = inlined_call_operand.hbm [shape: f32[2,32], index: 2, kind: output, shape index: {}]  }
   0x1   :  { %v22_v0 = vld [vmem:[%s192_s1] sm:$0xff]  ;;  %v23_v1 = vld [vmem:[%s192_s1 + $0x8] sm:$0xff]  ;;  %114 = vset.pattern.permute.xlu0 %v142_v2  ;;  %115 = vset.pattern.permute.xlu1 %v142_v2  ;;  %19 = vst.msk [vmem:[#allocation3] sm:$0x3] %vm18_vm1, %v143_v7 }
   0x2   :  { %v62_v3 = vsel %vm61_vm0, %v22_v0, 0.0  ;;  %v69_v4 = vsel %vm61_vm0, %v23_v1, 0.0  ;;  %27 = vperm.xlu0 %114, %v22_v0  }
   0x3   :  { %v63_v5 = vrot.slane %v62_v3, 4  ;;  %v70_v6 = vrot.slane %v69_v4, 4 }
   0x4   :  { %7 = vsyncpa [#allocation5], 0  ;;  %vm54_vm2 = vcmask 1041409   ;;  %vm16_vm3 = vcmask 254976   ;;  %v20_v23 = vld [vmem:[%s191_s0] sm:$0xff]  ;;  %vm37_vm4 = vcmask 261120  }
   0x5   :  { %v64_v8 = vadd.f32 %v63_v5, %v62_v3  ;;  %v71_v9 = vadd.f32 %v70_v6, %v69_v4  ;;  %17 = vst.msk [vmem:[#allocation2] sm:$0x3] %vm16_vm3, %v143_v7  ;;  %v21_v26 = vld [vmem:[%s191_s0 + $0x8] sm:$0xff]  ;;  %s144_s0 = smov [#allocation4]  }
   0x6   :  { %32 = vperm.xlu0 %114, %v23_v1   ;;  %s103_s16 = sshll.u32 %s144_s0, 4  ;;  %s104_s16 = int_to_ptr.vmem [resolvable:$true] %s103_s16 }
   0x7   :  { %v65_v10 = vrot.slane %v64_v8, 2  ;;  %v72_v11 = vrot.slane %v71_v9, 2  ;;  %s118_s17 = scalar_lea.vmem %s104_s16, 32  ;;  %p123_p1 = scmp.lt.s32.totalorder %s104_s16, %s104_s16 }
   0x8   :  { %v60_v18 = vld [vmem:[#allocation3] sm:$0x3]  ;;  %p119_p0 = scmp.ne.s32.totalorder %s104_s16, %s118_s17  ;;  %p124_p2 = scmp.lt.s32.totalorder %s118_s17, %s118_s17 }
   0x9   :  { %v66_v12 = vadd.f32 %v65_v10, %v64_v8  ;;  %v73_v13 = vadd.f32 %v72_v11, %v71_v9 }
   0xa   :  { %p125_p3 = por %p124_p2, %p123_p1 }
   0xb   :  { %v67_v14 = vrot.slane %v66_v12, 1  ;;  %v74_v15 = vrot.slane %v73_v13, 1 }
   0xc   :  { %v24_v43 = vld [vmem:[#allocation2] sm:$0x3]  ;;  %p126_p4 = pnand %p125_p3, %p119_p0 }
   0xd   :  { %v68_v16 = vadd.f32 %v67_v14, %v66_v12  ;;  %v75_v17 = vadd.f32 %v74_v15, %v73_v13 }
   0xf   :  { %v78_v19 = vsel %vm54_vm2, %v75_v17, %v68_v16 }
  0x10   :  { %v80_v20 = vadd.f32 %v78_v19, %v60_v18 }
  0x12   :  { %82 = vst.msk [vmem:[#allocation3] sm:$0x3] %vm18_vm1, %v80_v20 }
  0x19   :  { %v86_v21 = vld [vmem:[#allocation3] sm:$0x3] }
  0x1a   :  { %116 = vrcp.f32 %v86_v21 }
  0x24   :  { %v117_v22 = vpop.eup %116 }
  0x25   :  { %92 = vperm.xlu1 %115, %v117_v22  }
  0x81   :  { %v28_v24 = vpop.permute.xlu0 %27 }
  0x82   :  { %v35_v25 = vmul.f32 %v28_v24, %v20_v23 }
  0x84   :  { %v38_v27 = vsel %vm37_vm4, %v35_v25, 0.0 }
  0x85   :  { %v39_v28 = vrot.slane %v38_v27, 4  ;;  %v33_v29 = vpop.permute.xlu0 %32 }
  0x86   :  { %v36_v30 = vmul.f32 %v33_v29, %v21_v26 }
  0x87   :  { %v40_v31 = vadd.f32 %v39_v28, %v38_v27 }
  0x88   :  { %v45_v32 = vsel %vm37_vm4, %v36_v30, 0.0 }
  0x89   :  { %v41_v33 = vrot.slane %v40_v31, 2  ;;  %v46_v34 = vrot.slane %v45_v32, 4 }
  0x8b   :  { %v42_v35 = vadd.f32 %v41_v33, %v40_v31  ;;  %v47_v36 = vadd.f32 %v46_v34, %v45_v32 }
  0x8d   :  { %v48_v37 = vrot.slane %v47_v36, 2  ;;  %v43_v38 = vrot.slane %v42_v35, 1 }
  0x8f   :  { %v49_v39 = vadd.f32 %v48_v37, %v47_v36  ;;  %v44_v41 = vadd.f32 %v43_v38, %v42_v35 }
  0x91   :  { %v50_v40 = vrot.slane %v49_v39, 1 }
  0x93   :  { %v51_v42 = vadd.f32 %v50_v40, %v49_v39 }
  0x95   :  { %v55_v44 = vsel %vm54_vm2, %v51_v42, %v44_v41 }
  0x96   :  { %v57_v45 = vadd.f32 %v55_v44, %v24_v43 }
  0x98   :  { %59 = vst.msk [vmem:[#allocation2] sm:$0x3] %vm16_vm3, %v57_v45 }
  0x9f   :  { %v89_v47 = vld [vmem:[#allocation2] sm:$0x3] }
  0xa4   :  { %v93_v46 = vpop.permute.xlu1 %92 }
  0xa5   :  { %v95_v48 = vmul.f32 %v93_v46, %v89_v47 }
  0xa7   :  { %96 = vst.msk [vmem:[#allocation4] sm:$0x3] %vm16_vm3, %v95_v48 }
  0xa8   :  { %129 = shalt.err (!%p126_p4)
}
  0xa9   :  { %s130_s20 = scalar_lea.hbm %s193_s2, 32 }
  0xaa   :  { %p131_p5 = scmp.ne.s32.totalorder %s193_s2, %s130_s20  ;;  %p134_p6 = scmp.lt.u32.totalorder %s130_s20, %s193_s2 }
  0xac   :  { %p136_p7 = pnand %p134_p6, %p131_p5 }
  0xae   :  { %139 = shalt.err (!%p136_p7)
}
  0xaf   :  { %106 = dma.vmem_to_hbm [thread:$0]  %s104_s16, 32, %s193_s2, [#allocation5]  }
  0xb0   :  { %140 = dma.done.wait [#allocation5], 32  }
  0xb1   :  { %141 = vsyncadd [#allocation5], 4294967264 }
  0xb2   :  { %110 = vsyncpa [#allocation5], 1 }

</bundles_post_ra>
